<compile_context>
chip_gen: v6e
topology: v6e:2x2x1
jax: 0.10.0
libtpu: 0.0.40
codegen_flags: <defaults>
</compile_context>

<pallas_src>
import functools

import jax
import jax.numpy as jnp
from jax.experimental import pallas as pl
from jax.experimental.pallas import tpu as pltpu

_ROW_TILE = 256                        # max (N*C) rows per block
_TARGET_BLOCK_BYTES = 4 * 1024 * 1024  # ~4 MiB per input block (per buffer)
_MAX_COL_TILE = 128 * 1024             # cap on the lane-dim (spatial) tile
_VMEM_LIMIT = 40 * 1024 * 1024         # scoped VMEM budget (< v7x's 64 MiB)


def _round_up(x, k):
    return -(-x // k) * k


def _round_down(x, k):
    return (x // k) * k


# ----------------------------------------------------------------------------
# Kernel: per-(n,c) partial sums of intersection / union over spatial tiles
# ----------------------------------------------------------------------------
def _iou_partial_kernel(pred_ref, tgt_ref, inter_ref, union_ref, *,
                        l_total, col_tile, blocks_per_split, need_col_mask):
    j = pl.program_id(2)  # spatial-reduction axis (innermost, "arbitrary")

    @pl.when(j == 0)
    def _():
        inter_ref[...] = jnp.zeros_like(inter_ref)
        union_ref[...] = jnp.zeros_like(union_ref)

    p = jax.nn.sigmoid(pred_ref[...].astype(jnp.float32))
    t = tgt_ref[...].astype(jnp.float32)

    if need_col_mask:
        # In-kernel tail masking replaces the old jnp.pad HBM round trip.
        s = pl.program_id(1)
        col0 = (s * blocks_per_split + j) * col_tile
        col_ids = col0 + jax.lax.broadcasted_iota(jnp.int32, p.shape, 1)
        valid = col_ids < l_total
        p = jnp.where(valid, p, 0.0)
        t = jnp.where(valid, t, 0.0)

    pt = p * t
    inter_ref[...] += jnp.sum(pt, axis=1, keepdims=True)
    union_ref[...] += jnp.sum(p + t - pt, axis=1, keepdims=True)


# ----------------------------------------------------------------------------
# Wrapper
# ----------------------------------------------------------------------------
def iou_loss(pred, target, *, target_block_bytes=_TARGET_BLOCK_BYTES,
             max_col_tile=_MAX_COL_TILE):
    """Pallas IoU loss for NCHW `pred` (logits) and `target` (mask)."""
    n, c, h, w = pred.shape
    m = n * c
    l = h * w

    # NCHW -> (N*C, H*W): pure contiguous reshape, no transpose / extra HBM pass.
    p2 = pred.reshape(m, l)
    t2 = target.reshape(m, l)

    p_bytes = jnp.dtype(pred.dtype).itemsize
    t_bytes = jnp.dtype(target.dtype).itemsize

    # --- row tile: multiple of the sublane-packing unit, >=2 blocks if possible
    row_mult = 8 * max(1, 4 // min(p_bytes, t_bytes))   # 8 f32 / 16 bf16 / 32 i8
    if m <= row_mult:
        tm = m                                           # full dim (exempt rule)
    else:
        tm = min(_round_up(-(-m // 2), row_mult), _ROW_TILE)
        if tm >= m:
            tm = m
    row_blocks = -(-m // tm)

    # --- spatial tile: ~target_block_bytes per input block, lane-aligned ------
    bytes_per_elem = max(p_bytes, t_bytes)
    l128 = _round_up(l, 128)
    tl = _round_down(target_block_bytes // (tm * bytes_per_elem), 128)
    tl = min(tl, l128, max_col_tile)
    tl = max(tl, 128)
    ncb = -(-l // tl)                                    # true # of column blocks

    # --- 2-way parallel spatial split when the row axis alone can't feed 2 TCs
    ns = 2 if (row_blocks < 2 and ncb >= 2) else 1
    bps = -(-ncb // ns)                                  # column blocks per split
    need_col_mask = (ns * bps * tl) != l
    has_phantom = (ns * bps) > ncb                       # fully-OOB synthetic blocks

    if has_phantom:
        def _col_block(s, j):
            return jnp.minimum(s * bps + j, ncb - 1)     # clamp; mask zeroes it out
    else:
        def _col_block(s, j):
            return s * bps + j

    def in_map(i, s, j):
        return (i, _col_block(s, j))

    def out_map(i, s, j):
        return (s, i, 0)

    kernel = functools.partial(
        _iou_partial_kernel,
        l_total=l, col_tile=tl, blocks_per_split=bps, need_col_mask=need_col_mask)

    inter_p, union_p = pl.pallas_call(
        kernel,
        out_shape=(
            jax.ShapeDtypeStruct((ns, m, 1), jnp.float32),
            jax.ShapeDtypeStruct((ns, m, 1), jnp.float32),
        ),
        grid=(row_blocks, ns, bps),
        in_specs=[
            pl.BlockSpec((tm, tl), in_map),
            pl.BlockSpec((tm, tl), in_map),
        ],
        out_specs=(
            pl.BlockSpec((None, tm, 1), out_map),
            pl.BlockSpec((None, tm, 1), out_map),
        ),
        compiler_params=pltpu.CompilerParams(
            dimension_semantics=("parallel", "parallel", "arbitrary"),
            vmem_limit_bytes=_VMEM_LIMIT,
        ),
    )(p2, t2)

    # Finalize on a few-KB vector: fold the spatial splits, divide, 1 - mean.
    # Done in plain jnp (fuses in XLA) to avoid a second pallas_call's fixed cost.
    inter = jnp.sum(inter_p[..., 0], axis=0)   # (m,)
    union = jnp.sum(union_p[..., 0], axis=0)   # (m,)
    return 1.0 - jnp.mean(inter / union)


# ----------------------------------------------------------------------------
# Pure-JAX reference (mirrors the PyTorch IoULoss exactly)
# ----------------------------------------------------------------------------
def iou_loss_ref(pred, target):
    p = jax.nn.sigmoid(pred.astype(jnp.float32))
    t = target.astype(jnp.float32)
    inter = jnp.sum(p * t, axis=(2, 3))
    union = jnp.sum(p + t - p * t, axis=(2, 3))
    return 1.0 - jnp.mean(inter / union)


if __name__ == "__main__":
    key = jax.random.PRNGKey(0)

    loss_fn = jax.jit(iou_loss)
    small_tile_fn = jax.jit(functools.partial(iou_loss, max_col_tile=512))
    ref_fn = jax.jit(iou_loss_ref)

    cases = [
        ((2, 4, 16, 16), loss_fn),        # tile-aligned, single grid step
        ((2, 3, 67, 93), loss_fn),        # ragged spatial extent -> in-kernel mask
        ((4, 5, 32, 32), loss_fn),        # 2 parallel row blocks, partial last block
        ((2, 3, 67, 93), small_tile_fn),  # multi-step reduction + 2-way spatial split
    ]
    for shape, fn in cases:
        kp, kt, key = jax.random.split(key, 3)
        pred = jax.random.normal(kp, shape, jnp.float32)                      # logits
        target = (jax.random.uniform(kt, shape) > 0.5).astype(jnp.float32)    # mask

        out = jax.block_until_ready(fn(pred, target))
        ref = jax.block_until_ready(ref_fn(pred, target))

        assert out.shape == (), out.shape
        assert bool(jnp.isfinite(out)), out
        assert jnp.allclose(out, ref, rtol=1e-4, atol=1e-5), (shape, out, ref)

    print("KERNEL_OK")
</pallas_src>

<mosaic_0001>
module attributes {stable_mosaic.version = 11 : i64} {
  func.func @_iou_partial_kernel(%arg0: i32, %arg1: i32, %arg2: i32, %arg3: memref<8x256xf32, #tpu.memory_space<vmem>>, %arg4: memref<8x256xf32, #tpu.memory_space<vmem>>, %arg5: memref<1x8x1xf32, #tpu.memory_space<vmem>>, %arg6: memref<1x8x1xf32, #tpu.memory_space<vmem>>) attributes {dimension_semantics = [#tpu.dimension_semantics<parallel>, #tpu.dimension_semantics<parallel>, #tpu.dimension_semantics<arbitrary>], iteration_bounds = array<i64: 1, 1, 1>, scalar_prefetch = 0 : i64, scratch_operands = 0 : i64, tpu.core_type = #tpu.core_type<tc>, window_params = [{transform_indices = @transform_0, window_bounds = array<i64: 8, 256>}, {transform_indices = @transform_1, window_bounds = array<i64: 8, 256>}, {transform_indices = @transform_2, window_bounds = array<i64: 1, 8, 1>}, {transform_indices = @transform_3, window_bounds = array<i64: 1, 8, 1>}]} {
    %c0_i32 = arith.constant 0 : i32
    %0 = arith.cmpi eq, %arg2, %c0_i32 : i32
    %1 = arith.extui %0 : i1 to i32
    %c0_i32_0 = arith.constant 0 : i32
    %2 = arith.cmpi ne, %1, %c0_i32_0 : i32
    scf.if %2 {
      %cst_18 = arith.constant 0.000000e+00 : f32
      %29 = vector.broadcast %cst_18 : f32 to vector<8x1xf32>
      %c0_19 = arith.constant 0 : index
      %c0_20 = arith.constant 0 : index
      %c0_21 = arith.constant 0 : index
      %30 = vector.load %arg5[%c0_19, %c0_20, %c0_21] : memref<1x8x1xf32, #tpu.memory_space<vmem>>, vector<1x8x1xf32>
      %31 = vector.shape_cast %30 : vector<1x8x1xf32> to vector<8x1xf32>
      %32 = vector.shape_cast %29 : vector<8x1xf32> to vector<1x8x1xf32>
      tpu.vector_store %arg5[%c0_19, %c0_20, %c0_21], %32 {strides = array<i32>} : memref<1x8x1xf32, #tpu.memory_space<vmem>>, vector<1x8x1xf32>,
      %cst_22 = arith.constant 0.000000e+00 : f32
      %33 = vector.broadcast %cst_22 : f32 to vector<8x1xf32>
      %c0_23 = arith.constant 0 : index
      %c0_24 = arith.constant 0 : index
      %c0_25 = arith.constant 0 : index
      %34 = vector.load %arg6[%c0_23, %c0_24, %c0_25] : memref<1x8x1xf32, #tpu.memory_space<vmem>>, vector<1x8x1xf32>
      %35 = vector.shape_cast %34 : vector<1x8x1xf32> to vector<8x1xf32>
      %36 = vector.shape_cast %33 : vector<8x1xf32> to vector<1x8x1xf32>
      tpu.vector_store %arg6[%c0_23, %c0_24, %c0_25], %36 {strides = array<i32>} : memref<1x8x1xf32, #tpu.memory_space<vmem>>, vector<1x8x1xf32>,
    } else {
    }
    %c0 = arith.constant 0 : index
    %c0_1 = arith.constant 0 : index
    %3 = vector.load %arg3[%c0, %c0_1] : memref<8x256xf32, #tpu.memory_space<vmem>>, vector<8x256xf32>
    %4 = arith.negf %3 : vector<8x256xf32>
    %5 = math.exp %4 : vector<8x256xf32>
    %cst = arith.constant 1.000000e+00 : f32
    %6 = vector.broadcast %cst : f32 to vector<8x256xf32>
    %7 = arith.addf %6, %5 : vector<8x256xf32>
    %8 = arith.divf %6, %7 : vector<8x256xf32>
    %c0_2 = arith.constant 0 : index
    %c0_3 = arith.constant 0 : index
    %9 = vector.load %arg4[%c0_2, %c0_3] : memref<8x256xf32, #tpu.memory_space<vmem>>, vector<8x256xf32>
    %10 = arith.mulf %8, %9 : vector<8x256xf32>
    %c0_4 = arith.constant 0 : index
    %c0_5 = arith.constant 0 : index
    %c0_6 = arith.constant 0 : index
    %11 = vector.load %arg5[%c0_4, %c0_5, %c0_6] : memref<1x8x1xf32, #tpu.memory_space<vmem>>, vector<1x8x1xf32>
    %12 = vector.shape_cast %11 : vector<1x8x1xf32> to vector<8x1xf32>
    %cst_7 = arith.constant dense<0.000000e+00> : vector<8xf32>
    %13 = vector.multi_reduction <add>, %10, %cst_7 [1] : vector<8x256xf32> to vector<8xf32>
    %14 = vector.shape_cast %13 : vector<8xf32> to vector<8x1xf32>
    %15 = arith.addf %12, %14 : vector<8x1xf32>
    %c0_8 = arith.constant 0 : index
    %c0_9 = arith.constant 0 : index
    %c0_10 = arith.constant 0 : index
    %16 = vector.load %arg5[%c0_8, %c0_9, %c0_10] : memref<1x8x1xf32, #tpu.memory_space<vmem>>, vector<1x8x1xf32>
    %17 = vector.shape_cast %16 : vector<1x8x1xf32> to vector<8x1xf32>
    %18 = vector.shape_cast %15 : vector<8x1xf32> to vector<1x8x1xf32>
    tpu.vector_store %arg5[%c0_8, %c0_9, %c0_10], %18 {strides = array<i32>} : memref<1x8x1xf32, #tpu.memory_space<vmem>>, vector<1x8x1xf32>,
    %c0_11 = arith.constant 0 : index
    %c0_12 = arith.constant 0 : index
    %c0_13 = arith.constant 0 : index
    %19 = vector.load %arg6[%c0_11, %c0_12, %c0_13] : memref<1x8x1xf32, #tpu.memory_space<vmem>>, vector<1x8x1xf32>
    %20 = vector.shape_cast %19 : vector<1x8x1xf32> to vector<8x1xf32>
    %21 = arith.addf %8, %9 : vector<8x256xf32>
    %22 = arith.subf %21, %10 : vector<8x256xf32>
    %cst_14 = arith.constant dense<0.000000e+00> : vector<8xf32>
    %23 = vector.multi_reduction <add>, %22, %cst_14 [1] : vector<8x256xf32> to vector<8xf32>
    %24 = vector.shape_cast %23 : vector<8xf32> to vector<8x1xf32>
    %25 = arith.addf %20, %24 : vector<8x1xf32>
    %c0_15 = arith.constant 0 : index
    %c0_16 = arith.constant 0 : index
    %c0_17 = arith.constant 0 : index
    %26 = vector.load %arg6[%c0_15, %c0_16, %c0_17] : memref<1x8x1xf32, #tpu.memory_space<vmem>>, vector<1x8x1xf32>
    %27 = vector.shape_cast %26 : vector<1x8x1xf32> to vector<8x1xf32>
    %28 = vector.shape_cast %25 : vector<8x1xf32> to vector<1x8x1xf32>
    tpu.vector_store %arg6[%c0_15, %c0_16, %c0_17], %28 {strides = array<i32>} : memref<1x8x1xf32, #tpu.memory_space<vmem>>, vector<1x8x1xf32>,
    return
  }
  func.func @transform_0(%arg0: i32, %arg1: i32, %arg2: i32) -> (i32, i32) {
    %c1_i32 = arith.constant 1 : i32
    %0 = arith.muli %arg1, %c1_i32 : i32
    %1 = arith.addi %0, %arg2 : i32
    %c0_i32 = arith.constant 0 : i32
    return %arg0, %1 : i32, i32
  }
  func.func @transform_1(%arg0: i32, %arg1: i32, %arg2: i32) -> (i32, i32) {
    %c1_i32 = arith.constant 1 : i32
    %0 = arith.muli %arg1, %c1_i32 : i32
    %1 = arith.addi %0, %arg2 : i32
    %c0_i32 = arith.constant 0 : i32
    return %arg0, %1 : i32, i32
  }
  func.func @transform_2(%arg0: i32, %arg1: i32, %arg2: i32) -> (i32, i32, i32) {
    %c0_i32 = arith.constant 0 : i32
    %c0_i32_0 = arith.constant 0 : i32
    return %arg1, %arg0, %c0_i32 : i32, i32, i32
  }
  func.func @transform_3(%arg0: i32, %arg1: i32, %arg2: i32) -> (i32, i32, i32) {
    %c0_i32 = arith.constant 0 : i32
    %c0_i32_0 = arith.constant 0 : i32
    return %arg1, %arg0, %c0_i32 : i32, i32, i32
  }
}

</mosaic_0001>

<bundles_post_ra>
// kernel: iou_loss.1
= control target key start
LH: loop header
LB: loop body
LE: loop exit
PB: predicated region body
PF: predicated region fallthrough
CT: control target
= control target key end

     0   :  { %vm61_vm0 = vcmask 7168   ;;  %v130_v2 = vmov 0.0   ;;  %s185_s0 = inlined_call_operand.vmem [shape: f32[8,256], index: 0, kind: input, shape index: {}]   ;;  %s186_s2 = inlined_call_operand.vmem [shape: f32[1,8,1], index: 2, kind: output, shape index: {0}]   ;;  %s187_s1 = inlined_call_operand.vmem [shape: f32[8,256], index: 1, kind: input, shape index: {}]   ;;  %s188_s3 = inlined_call_operand.vmem [shape: f32[1,8,1], index: 3, kind: output, shape index: {1}]  }
   0x1   :  { %v64_v0 = vld [vmem:[%s185_s0] sm:$0xff]  ;;  %v65_v1 = vld [vmem:[%s185_s0 + $0x8] sm:$0xff]  ;;  %62 = vst.msk [vmem:[%s186_s2] sm:$0xff] %vm61_vm0, %v130_v2  ;;  %63 = vst.msk [vmem:[%s188_s3] sm:$0xff] %vm61_vm0, %v130_v2 }
   0x2   :  { %v119_v3 = vmul.f32 -1.442695, %v64_v0  ;;  %v120_v4 = vmul.f32 -1.442695, %v65_v1  ;;  %v78_v9 = vld [vmem:[%s187_s1] sm:$0xff]  ;;  %v79_v10 = vld [vmem:[%s187_s1 + $0x8] sm:$0xff] }
   0x4   :  { %122 = vpow2.f32 %v119_v3 }
   0x5   :  { %124 = vpow2.f32 %v120_v4 }
   0x8   :  { %v82_v21 = vld [vmem:[%s186_s2] sm:$0xff] }
   0x9   :  { %v89_v24 = vld [vmem:[%s188_s3] sm:$0xff] }
  0x11   :  { %v123_v5 = vpop.eup %122 }
  0x12   :  { %v125_v6 = vpop.eup %124  ;;  %v72_v7 = vadd.f32 1.0, %v123_v5 }
  0x13   :  { %v73_v8 = vadd.f32 1.0, %v125_v6 }
  0x14   :  { %126 = vrcp.f32 %v72_v7 }
  0x15   :  { %128 = vrcp.f32 %v73_v8 }
  0x21   :  { %v127_v11 = vpop.eup %126 }
  0x22   :  { %v129_v12 = vpop.eup %128  ;;  %v80_v13 = vmul.f32 %v127_v11, %v78_v9  ;;  %v90_v14 = vadd.f32 %v127_v11, %v78_v9 }
  0x23   :  { %v81_v15 = vmul.f32 %v129_v12, %v79_v10  ;;  %v91_v16 = vadd.f32 %v129_v12, %v79_v10 }
  0x24   :  { %v92_v17 = vsub.f32 %v90_v14, %v80_v13 }
  0x25   :  { %v83_v18 = vadd.f32 %v81_v15, %v80_v13  ;;  %v93_v19 = vsub.f32 %v91_v16, %v81_v15 }
  0x27   :  { %84 = vadd.xlane.f32.xlu0 %v83_v18  ;;  %v94_v20 = vadd.f32 %v93_v19, %v92_v17 }
  0x2b   :  { %95 = vadd.xlane.f32.xlu0 %v94_v20 }
  0xb0   :  { %v85_v22 = vpop.xlane.xlu0 %84 }
  0xb1   :  { %v86_v23 = vadd.f32 %v85_v22, %v82_v21 }
  0xb3   :  { %88 = vst.msk [vmem:[%s186_s2] sm:$0xff] %vm61_vm0, %v86_v23 }
  0xb4   :  { %v96_v25 = vpop.xlane.xlu0 %95 }
  0xb5   :  { %v97_v26 = vadd.f32 %v96_v25, %v89_v24 }
  0xb7   :  { %98 = vst.msk [vmem:[%s188_s3] sm:$0xff] %vm61_vm0, %v97_v26 }

</bundles_post_ra>
